<compile_context>
chip_gen: v7x
topology: tpu7x:2x2x1
jax: 0.10.0
libtpu: 0.0.40
codegen_flags: <defaults>
</compile_context>

<pallas_src>
import functools

import jax
import jax.numpy as jnp
import numpy as np
from jax.experimental import pallas as pl
from jax.experimental.pallas import tpu as pltpu

K = 3        # conv kernel size
HALO = 4     # zero-padded halo rows on each side of an L-tile window (8-row aligned)


def _round_up(a, m):
    return (a + m - 1) // m * m


def _chip_config():
    """(tl_target, vmem_limit_bytes, prefer_fused_taps) per TPU generation."""
    kind = ""
    try:
        kind = jax.devices()[0].device_kind.lower()
    except Exception:
        pass
    if "v7" in kind:                         # 64 MiB physical VMEM, 2x256 MXU, 2 TCs
        return 1024, 48 * 1024 * 1024, True
    if "v6" in kind:                         # 128 MiB VMEM, 2x256 MXU
        return 1024, 64 * 1024 * 1024, True
    if "v5e" in kind or "v5 lite" in kind or "v5litepod" in kind:
        return 512, 64 * 1024 * 1024, False  # 4x128 MXU: K=Cp=128 already optimal
    return 512, None, False                  # unknown chip: conservative defaults


def _resblock_kernel(x_hbm, w1_ref, a1_ref, w2_ref, a2_ref, o_ref, xwin, sem,
                     *, l_valid, tl, cp, fuse):
    # x_hbm : (N, Lp+8, Cp) f32   raw HBM ref (manual windowed DMA)
    # w*_ref: (3*Cp, Cp)    bf16  conv taps stacked along the contraction dim
    # a*_ref: (2, Cp)       f32   row 0 = BN scale, row 1 = folded bias + BN shift
    # o_ref : (1, TL, Cp)   f32   output tile (rows [l*TL, l*TL+TL) of sample n)
    # xwin  : (2, TL+8, Cp) f32   double-buffered input-window scratch
    # sem   : (2,) DMA semaphores
    # Window-local row r of xwin corresponds to global sequence row l*TL - 4 + r.
    n = pl.program_id(0)
    l = pl.program_id(1)
    n_lt = pl.num_programs(1)
    tlw = tl + 2 * HALO
    slot = l & 1

    def fetch(li, s):
        start = pl.multiple_of(li * tl, 8)            # 8-row aligned window start
        pltpu.make_async_copy(x_hbm.at[n, pl.ds(start, tlw), :],
                              xwin.at[s], sem.at[s]).start()

    # First tile of each sample: nothing prefetched it -> fetch, then wait below.
    @pl.when(l == 0)
    def _():
        fetch(l, 0)

    # Wait for this tile's window; then prefetch the next tile of this sample
    # (valid because the l axis is "arbitrary": sequential per sample, per core).
    pltpu.make_async_copy(x_hbm.at[n, pl.ds(0, tlw), :], xwin.at[slot],
                          sem.at[slot]).wait()

    @pl.when(l + 1 < n_lt)
    def _():
        fetch(l + 1, 1 - slot)

    win = xwin[slot]                                   # (TL+8, Cp) f32
    s1, b1 = a1_ref[0:1, :], a1_ref[1:2, :]
    s2, b2 = a2_ref[0:1, :], a2_ref[1:2, :]

    # ---- conv1 over TL+2 rows (global rows [l*TL-1, l*TL+TL+1)) ----------------
    if fuse:
        # im2col: one K=3*Cp contraction fills the 256-deep MXU (v6e/v7x).
        xcat = jnp.concatenate([win[2:tl + 4], win[3:tl + 5], win[4:tl + 6]],
                               axis=-1).astype(jnp.bfloat16)      # (TL+2, 3*Cp)
        h = jnp.dot(xcat, w1_ref[...], preferred_element_type=jnp.float32)
    else:
        h = jnp.dot(win[2:tl + 4].astype(jnp.bfloat16), w1_ref[0:cp],
                    preferred_element_type=jnp.float32)
        h = h + jnp.dot(win[3:tl + 5].astype(jnp.bfloat16), w1_ref[cp:2 * cp],
                        preferred_element_type=jnp.float32)
        h = h + jnp.dot(win[4:tl + 6].astype(jnp.bfloat16), w1_ref[2 * cp:3 * cp],
                        preferred_element_type=jnp.float32)
    h = jnp.maximum(h * s1 + b1, 0.0)                  # bn1 (f32 scale) + relu

    # conv2's `padding=1` zeros: h rows whose global index is outside [0, L)
    # (tile halos, sequence ends, L round-up rows) must be exactly zero.
    g = (l * tl - 1) + jax.lax.broadcasted_iota(jnp.int32, (tl + 2, 1), 0)
    h = jnp.where((g >= 0) & (g < l_valid), h, 0.0)

    # ---- conv2 over TL rows -----------------------------------------------------
    h_bf = h.astype(jnp.bfloat16)
    if fuse:
        hcat = jnp.concatenate([h_bf[0:tl], h_bf[1:tl + 1], h_bf[2:tl + 2]],
                               axis=-1)                # (TL, 3*Cp)
        y = jnp.dot(hcat, w2_ref[...], preferred_element_type=jnp.float32)
    else:
        y = jnp.dot(h_bf[0:tl], w2_ref[0:cp], preferred_element_type=jnp.float32)
        y = y + jnp.dot(h_bf[1:tl + 1], w2_ref[cp:2 * cp],
                        preferred_element_type=jnp.float32)
        y = y + jnp.dot(h_bf[2:tl + 2], w2_ref[2 * cp:3 * cp],
                        preferred_element_type=jnp.float32)

    # ---- bn2 + residual (stride=1, downsample=None) + relu, all in f32 ----------
    y = y * s2 + b2 + win[4:tl + 4]
    o_ref[0] = jnp.maximum(y, 0.0).astype(o_ref.dtype)


def residual_block_1d_nlc(x_nlc, params, eps=1e-5, fuse_taps=None, tile_len=None):
    """Channels-last entry point: x (N, L, C) f32 -> (N, L, C) f32.

    Prefer this form when the surrounding model keeps activations channels-last;
    it avoids the two NCL<->NLC transposes of `residual_block_1d` (HBM-bound win).
    """
    (w1, b1, g1, be1, m1, v1, w2, b2, g2, be2, m2, v2) = params
    N, L, C = x_nlc.shape

    tl_target, vmem_limit, prefer_fused = _chip_config()
    Cp = _round_up(max(C, 128), 128)                    # lane-dense channel dim

    if tile_len is not None:
        tl_target = max(8, _round_up(tile_len, 8))
    else:
        # Keep per-step VMEM roughly constant as channels grow.
        tl_target = max(64, tl_target * 256 // max(Cp, 256))
    # Balanced tiles: minimal L round-up waste (e.g. L=300 @ target 256 -> TL=152).
    n_lt = -(-L // tl_target)
    TL = _round_up(-(-L // n_lt), 8)
    Lp = n_lt * TL

    if fuse_taps is None:
        fuse_taps = prefer_fused and Cp >= 256          # K=3*Cp only pays on 256-deep MXUs

    # ---- fold conv bias + BN shift (eval mode); BN scale applied in-kernel f32 ----
    s1 = g1 / jnp.sqrt(v1 + eps)
    s2 = g2 / jnp.sqrt(v2 + eps)
    sh1 = (b1 - m1) * s1 + be1
    sh2 = (b2 - m2) * s2 + be2
    aff1 = jnp.stack([jnp.pad(s1, (0, Cp - C)),
                      jnp.pad(sh1, (0, Cp - C))]).astype(jnp.float32)   # (2, Cp)
    aff2 = jnp.stack([jnp.pad(s2, (0, Cp - C)),
                      jnp.pad(sh2, (0, Cp - C))]).astype(jnp.float32)

    # PyTorch conv weight (Cout, Cin, K) -> (K*Cin, Cout), channel-padded, bf16.
    def prep_w(w):
        w = jnp.transpose(w, (2, 1, 0)).astype(jnp.float32)             # (K, Cin, Cout)
        w = jnp.pad(w, ((0, 0), (0, Cp - C), (0, Cp - C)))
        return w.reshape(K * Cp, Cp).astype(jnp.bfloat16)
    w1e, w2e = prep_w(w1), prep_w(w2)

    # 4-row zero halo on each side of L (covers conv1+conv2 reach, keeps every DMA
    # window 8-row aligned), round L up to Lp, pad channels to Cp.
    xp = jnp.pad(x_nlc.astype(jnp.float32),
                 ((0, 0), (HALO, HALO + Lp - L), (0, Cp - C)))          # (N, Lp+8, Cp)

    kernel = functools.partial(_resblock_kernel, l_valid=L, tl=TL, cp=Cp,
                               fuse=fuse_taps)

    grid_spec = pltpu.PrefetchScalarGridSpec(
        num_scalar_prefetch=0,
        grid=(N, n_lt),
        in_specs=[
            pl.BlockSpec(memory_space=pl.ANY),                          # x: manual DMA
            pl.BlockSpec((K * Cp, Cp), lambda n, l: (0, 0)),            # w1 (resident)
            pl.BlockSpec((2, Cp), lambda n, l: (0, 0)),                 # scale/shift 1
            pl.BlockSpec((K * Cp, Cp), lambda n, l: (0, 0)),            # w2 (resident)
            pl.BlockSpec((2, Cp), lambda n, l: (0, 0)),                 # scale/shift 2
        ],
        out_specs=pl.BlockSpec((1, TL, Cp), lambda n, l: (n, l, 0)),
        scratch_shapes=[
            pltpu.VMEM((2, TL + 2 * HALO, Cp), jnp.float32),            # x window x2
            pltpu.SemaphoreType.DMA((2,)),
        ],
    )

    # N "parallel" (megacore split on samples); l must be "arbitrary" so the
    # per-sample DMA prefetch chain (step l prefetches window l+1) is valid.
    cp_kwargs = dict(dimension_semantics=("parallel", "arbitrary"))
    if vmem_limit is not None:
        cp_kwargs["vmem_limit_bytes"] = vmem_limit

    out_nlc = pl.pallas_call(
        kernel,
        out_shape=jax.ShapeDtypeStruct((N, Lp, Cp), jnp.float32),
        grid_spec=grid_spec,
        compiler_params=pltpu.CompilerParams(**cp_kwargs),
    )(xp, w1e, aff1, w2e, aff2)

    # Rows >= L / channels >= C of the padded buffer contain garbage by design.
    return out_nlc[:, :L, :C]


def residual_block_1d(x_ncl, params, eps=1e-5, fuse_taps=None, tile_len=None):
    """PyTorch-layout entry point: x (N, C, L) f32 -> (N, C, L) f32."""
    out = residual_block_1d_nlc(jnp.transpose(x_ncl, (0, 2, 1)), params,
                                eps=eps, fuse_taps=fuse_taps, tile_len=tile_len)
    return jnp.transpose(out, (0, 2, 1))


def _reference(x_ncl, params, eps=1e-5):
    """Pure-JAX reference (lax conv) for correctness check."""
    (w1, b1, g1, be1, m1, v1, w2, b2, g2, be2, m2, v2) = params

    def conv(x, w, b):
        y = jax.lax.conv_general_dilated(
            x, w, window_strides=(1,), padding=((1, 1),),
            dimension_numbers=("NCH", "OIH", "NCH"))
        return y + b[None, :, None]

    def bn(x, g, be, m, v):
        return (x - m[None, :, None]) / jnp.sqrt(v[None, :, None] + eps) \
            * g[None, :, None] + be[None, :, None]

    out = jax.nn.relu(bn(conv(x_ncl, w1, b1), g1, be1, m1, v1))
    out = bn(conv(out, w2, b2), g2, be2, m2, v2)
    return jax.nn.relu(out + x_ncl)


if __name__ == "__main__":
    def make_params(key, C, wscale):
        ks = jax.random.split(key, 8)
        w1 = jax.random.normal(ks[0], (C, C, K), jnp.float32) * wscale
        b1 = jax.random.normal(ks[1], (C,), jnp.float32) * 0.1
        w2 = jax.random.normal(ks[2], (C, C, K), jnp.float32) * wscale
        b2 = jax.random.normal(ks[3], (C,), jnp.float32) * 0.1
        g1 = 1.0 + 0.1 * jax.random.normal(ks[4], (C,), jnp.float32)
        be1 = 0.1 * jax.random.normal(ks[5], (C,), jnp.float32)
        m1 = 0.1 * jax.random.normal(ks[6], (C,), jnp.float32)
        v1 = 1.0 + jnp.abs(0.1 * jax.random.normal(ks[7], (C,), jnp.float32))
        g2 = 1.0 - 0.05 * g1
        be2 = -0.5 * be1
        m2 = 0.3 * m1
        v2 = 1.0 + jnp.abs(0.2 * be1)
        return (w1, b1, g1, be1, m1, v1, w2, b2, g2, be2, m2, v2)

    key = jax.random.PRNGKey(0)
    k1, k2, k3, k4 = jax.random.split(key, 4)
    TOL = dict(rtol=3e-2, atol=3e-2)   # bf16 matmul operands, f32 accumulation

    # Case 1: small channels (Cp=128), 3-tap K=Cp matmul path, single L-tile.
    N, C, L = 2, 32, 20
    params = make_params(k1, C, 0.1)
    x = jax.random.normal(k2, (N, C, L), jnp.float32)
    ref = _reference(x, params)
    out = jax.block_until_ready(residual_block_1d(x, params))
    np.testing.assert_allclose(np.asarray(out), np.asarray(ref), **TOL)

    # Case 1b: same data, tiny forced tile -> exercises the multi-tile windowed
    # DMA prefetch chain, halo masking, and L round-up masking.
    out_t = jax.block_until_ready(residual_block_1d(x, params, tile_len=8))
    np.testing.assert_allclose(np.asarray(out_t), np.asarray(ref), **TOL)

    # Case 2: Cp=256 with the fused-tap (K=3*Cp im2col) path forced on, multi-tile,
    # so the v6e/v7x code path is exercised regardless of which chip runs the test.
    N2, C2, L2 = 1, 256, 40
    params2 = make_params(k3, C2, 0.03)
    x2 = jax.random.normal(k4, (N2, C2, L2), jnp.float32)
    ref2 = _reference(x2, params2)
    out2 = jax.block_until_ready(
        residual_block_1d(x2, params2, fuse_taps=True, tile_len=16))
    np.testing.assert_allclose(np.asarray(out2), np.asarray(ref2), **TOL)

    print("KERNEL_OK")
</pallas_src>

<mosaic_0001>
module attributes {stable_mosaic.version = 11 : i64} {
  func.func @_resblock_kernel(%arg0: i32, %arg1: i32, %arg2: memref<2x32x128xf32, #tpu.memory_space<any>>, %arg3: memref<384x128xbf16, #tpu.memory_space<vmem>>, %arg4: memref<2x128xf32, #tpu.memory_space<vmem>>, %arg5: memref<384x128xbf16, #tpu.memory_space<vmem>>, %arg6: memref<2x128xf32, #tpu.memory_space<vmem>>, %arg7: memref<1x24x128xf32, #tpu.memory_space<vmem>>, %arg8: memref<2x32x128xf32, #tpu.memory_space<vmem>>, %arg9: memref<2x!tpu.dma_semaphore, #tpu.memory_space<semaphore_mem>>) attributes {dimension_semantics = [#tpu.dimension_semantics<parallel>, #tpu.dimension_semantics<arbitrary>], iteration_bounds = array<i64: 2, 1>, scalar_prefetch = 0 : i64, scratch_operands = 2 : i64, tpu.core_type = #tpu.core_type<tc>, window_params = [{}, {pipeline_mode = #tpu.pipeline_mode<synchronous>, transform_indices = @transform_1, window_bounds = array<i64: 384, 128>}, {pipeline_mode = #tpu.pipeline_mode<synchronous>, transform_indices = @transform_2, window_bounds = array<i64: 2, 128>}, {pipeline_mode = #tpu.pipeline_mode<synchronous>, transform_indices = @transform_3, window_bounds = array<i64: 384, 128>}, {pipeline_mode = #tpu.pipeline_mode<synchronous>, transform_indices = @transform_4, window_bounds = array<i64: 2, 128>}, {transform_indices = @transform_5, window_bounds = array<i64: 1, 24, 128>}]} {
    %c1_i32 = arith.constant 1 : i32
    %0 = arith.andi %arg1, %c1_i32 : i32
    %c0_i32 = arith.constant 0 : i32
    %1 = arith.cmpi eq, %arg1, %c0_i32 : i32
    %2 = arith.extui %1 : i1 to i32
    %c0_i32_0 = arith.constant 0 : i32
    %3 = arith.cmpi ne, %2, %c0_i32_0 : i32
    scf.if %3 {
      %c24_i32_39 = arith.constant 24 : i32
      %78 = arith.muli %arg1, %c24_i32_39 : i32
      %79 = tpu.assume_multiple %78, 8 : i32
      %c0_i32_40 = arith.constant 0 : i32
      %c0_i32_41 = arith.constant 0 : i32
      %c0_i32_42 = arith.constant 0 : i32
      %80 = tpu.memref_slice %arg2[%arg0, %79, %c0_i32_42] : memref<2x32x128xf32, #tpu.memory_space<any>> -> memref<1x32x128xf32, #tpu.memory_space<any>>
      %81 = tpu.memref_squeeze %80 : memref<1x32x128xf32, #tpu.memory_space<any>> -> memref<32x128xf32, #tpu.memory_space<any>>
      %c0_i32_43 = arith.constant 0 : i32
      %c0_i32_44 = arith.constant 0 : i32
      %82 = tpu.memref_slice %arg8[%c0_i32_40, %c0_i32_43, %c0_i32_44] : memref<2x32x128xf32, #tpu.memory_space<vmem>> -> memref<1x32x128xf32, #tpu.memory_space<vmem>>
      %83 = tpu.memref_squeeze %82 : memref<1x32x128xf32, #tpu.memory_space<vmem>> -> memref<32x128xf32, #tpu.memory_space<vmem>>
      %84 = tpu.memref_slice %arg9[%c0_i32_41] : memref<2x!tpu.dma_semaphore, #tpu.memory_space<semaphore_mem>> -> memref<1x!tpu.dma_semaphore, #tpu.memory_space<semaphore_mem>>
      %85 = tpu.memref_squeeze %84 : memref<1x!tpu.dma_semaphore, #tpu.memory_space<semaphore_mem>> -> memref<!tpu.dma_semaphore, #tpu.memory_space<semaphore_mem>>
      tpu.enqueue_dma source(%81 : memref<32x128xf32, #tpu.memory_space<any>>) target(%83 : memref<32x128xf32, #tpu.memory_space<vmem>>) target_semaphore(%85 : memref<!tpu.dma_semaphore, #tpu.memory_space<semaphore_mem>>)
    } else {
    }
    %c0_i32_1 = arith.constant 0 : i32
    %c0_i32_2 = arith.constant 0 : i32
    %4 = tpu.memref_slice %arg2[%arg0, %c0_i32_1, %c0_i32_2] : memref<2x32x128xf32, #tpu.memory_space<any>> -> memref<1x32x128xf32, #tpu.memory_space<any>>
    %5 = tpu.memref_squeeze %4 : memref<1x32x128xf32, #tpu.memory_space<any>> -> memref<32x128xf32, #tpu.memory_space<any>>
    %c0_i32_3 = arith.constant 0 : i32
    %c0_i32_4 = arith.constant 0 : i32
    %6 = tpu.memref_slice %arg8[%0, %c0_i32_3, %c0_i32_4] : memref<2x32x128xf32, #tpu.memory_space<vmem>> -> memref<1x32x128xf32, #tpu.memory_space<vmem>>
    %7 = tpu.memref_squeeze %6 : memref<1x32x128xf32, #tpu.memory_space<vmem>> -> memref<32x128xf32, #tpu.memory_space<vmem>>
    %8 = tpu.memref_slice %arg9[%0] : memref<2x!tpu.dma_semaphore, #tpu.memory_space<semaphore_mem>> -> memref<1x!tpu.dma_semaphore, #tpu.memory_space<semaphore_mem>>
    %9 = tpu.memref_squeeze %8 : memref<1x!tpu.dma_semaphore, #tpu.memory_space<semaphore_mem>> -> memref<!tpu.dma_semaphore, #tpu.memory_space<semaphore_mem>>
    tpu.wait_dma2 semaphore(%9 : memref<!tpu.dma_semaphore, #tpu.memory_space<semaphore_mem>>) src(%5 : memref<32x128xf32, #tpu.memory_space<any>>) dst(%7 : memref<32x128xf32, #tpu.memory_space<vmem>>)
    %c1_i32_5 = arith.constant 1 : i32
    %10 = arith.addi %arg1, %c1_i32_5 : i32
    %c1_i32_6 = arith.constant 1 : i32
    %11 = arith.cmpi slt, %10, %c1_i32_6 : i32
    %12 = arith.extui %11 : i1 to i32
    %c0_i32_7 = arith.constant 0 : i32
    %13 = arith.cmpi ne, %12, %c0_i32_7 : i32
    scf.if %13 {
      %c1_i32_39 = arith.constant 1 : i32
      %78 = arith.addi %arg1, %c1_i32_39 : i32
      %c1_i32_40 = arith.constant 1 : i32
      %79 = arith.subi %c1_i32_40, %0 : i32
      %c24_i32_41 = arith.constant 24 : i32
      %80 = arith.muli %78, %c24_i32_41 : i32
      %81 = tpu.assume_multiple %80, 8 : i32
      %c0_i32_42 = arith.constant 0 : i32
      %82 = tpu.memref_slice %arg2[%arg0, %81, %c0_i32_42] : memref<2x32x128xf32, #tpu.memory_space<any>> -> memref<1x32x128xf32, #tpu.memory_space<any>>
      %83 = tpu.memref_squeeze %82 : memref<1x32x128xf32, #tpu.memory_space<any>> -> memref<32x128xf32, #tpu.memory_space<any>>
      %c0_i32_43 = arith.constant 0 : i32
      %c0_i32_44 = arith.constant 0 : i32
      %84 = tpu.memref_slice %arg8[%79, %c0_i32_43, %c0_i32_44] : memref<2x32x128xf32, #tpu.memory_space<vmem>> -> memref<1x32x128xf32, #tpu.memory_space<vmem>>
      %85 = tpu.memref_squeeze %84 : memref<1x32x128xf32, #tpu.memory_space<vmem>> -> memref<32x128xf32, #tpu.memory_space<vmem>>
      %86 = tpu.memref_slice %arg9[%79] : memref<2x!tpu.dma_semaphore, #tpu.memory_space<semaphore_mem>> -> memref<1x!tpu.dma_semaphore, #tpu.memory_space<semaphore_mem>>
      %87 = tpu.memref_squeeze %86 : memref<1x!tpu.dma_semaphore, #tpu.memory_space<semaphore_mem>> -> memref<!tpu.dma_semaphore, #tpu.memory_space<semaphore_mem>>
      tpu.enqueue_dma source(%83 : memref<32x128xf32, #tpu.memory_space<any>>) target(%85 : memref<32x128xf32, #tpu.memory_space<vmem>>) target_semaphore(%87 : memref<!tpu.dma_semaphore, #tpu.memory_space<semaphore_mem>>)
    } else {
    }
    %14 = arith.index_cast %0 : i32 to index
    %c0 = arith.constant 0 : index
    %c0_8 = arith.constant 0 : index
    %15 = vector.load %arg8[%14, %c0, %c0_8] : memref<2x32x128xf32, #tpu.memory_space<vmem>>, vector<1x32x128xf32>
    %16 = vector.shape_cast %15 : vector<1x32x128xf32> to vector<32x128xf32>
    %c0_9 = arith.constant 0 : index
    %c0_10 = arith.constant 0 : index
    %17 = vector.load %arg4[%c0_9, %c0_10] : memref<2x128xf32, #tpu.memory_space<vmem>>, vector<1x128xf32>
    %c1 = arith.constant 1 : index
    %c0_11 = arith.constant 0 : index
    %18 = vector.load %arg4[%c1, %c0_11] : memref<2x128xf32, #tpu.memory_space<vmem>>, vector<1x128xf32>
    %c0_12 = arith.constant 0 : index
    %c0_13 = arith.constant 0 : index
    %19 = vector.load %arg6[%c0_12, %c0_13] : memref<2x128xf32, #tpu.memory_space<vmem>>, vector<1x128xf32>
    %c1_14 = arith.constant 1 : index
    %c0_15 = arith.constant 0 : index
    %20 = vector.load %arg6[%c1_14, %c0_15] : memref<2x128xf32, #tpu.memory_space<vmem>>, vector<1x128xf32>
    %21 = vector.extract_strided_slice %16 {offsets = [2, 0], sizes = [26, 128], strides = [1, 1]} : vector<32x128xf32> to vector<26x128xf32>
    %22 = arith.truncf %21 : vector<26x128xf32> to vector<26x128xbf16>
    %c0_16 = arith.constant 0 : index
    %c0_17 = arith.constant 0 : index
    %23 = vector.load %arg3[%c0_16, %c0_17] : memref<384x128xbf16, #tpu.memory_space<vmem>>, vector<128x128xbf16>
    %cst = arith.constant dense<0.000000e+00> : vector<26x128xf32>
    %24 = tpu.matmul %22, %23, %cst {dimension_numbers = #tpu.dot_dimension_numbers<[1], [0], [0], [1], [0, 0, 1, 1], [], []>} : vector<26x128xbf16>, vector<128x128xbf16>, vector<26x128xf32> -> vector<26x128xf32>
    %25 = vector.extract_strided_slice %16 {offsets = [3, 0], sizes = [26, 128], strides = [1, 1]} : vector<32x128xf32> to vector<26x128xf32>
    %26 = arith.truncf %25 : vector<26x128xf32> to vector<26x128xbf16>
    %c128 = arith.constant 128 : index
    %c0_18 = arith.constant 0 : index
    %27 = vector.load %arg3[%c128, %c0_18] : memref<384x128xbf16, #tpu.memory_space<vmem>>, vector<128x128xbf16>
    %cst_19 = arith.constant dense<0.000000e+00> : vector<26x128xf32>
    %28 = tpu.matmul %26, %27, %cst_19 {dimension_numbers = #tpu.dot_dimension_numbers<[1], [0], [0], [1], [0, 0, 1, 1], [], []>} : vector<26x128xbf16>, vector<128x128xbf16>, vector<26x128xf32> -> vector<26x128xf32>
    %29 = arith.addf %24, %28 : vector<26x128xf32>
    %30 = vector.extract_strided_slice %16 {offsets = [4, 0], sizes = [26, 128], strides = [1, 1]} : vector<32x128xf32> to vector<26x128xf32>
    %31 = arith.truncf %30 : vector<26x128xf32> to vector<26x128xbf16>
    %c256 = arith.constant 256 : index
    %c0_20 = arith.constant 0 : index
    %32 = vector.load %arg3[%c256, %c0_20] : memref<384x128xbf16, #tpu.memory_space<vmem>>, vector<128x128xbf16>
    %cst_21 = arith.constant dense<0.000000e+00> : vector<26x128xf32>
    %33 = tpu.matmul %31, %32, %cst_21 {dimension_numbers = #tpu.dot_dimension_numbers<[1], [0], [0], [1], [0, 0, 1, 1], [], []>} : vector<26x128xbf16>, vector<128x128xbf16>, vector<26x128xf32> -> vector<26x128xf32>
    %34 = arith.addf %29, %33 : vector<26x128xf32>
    %35 = vector.broadcast %17 : vector<1x128xf32> to vector<26x128xf32>
    %36 = arith.mulf %34, %35 : vector<26x128xf32>
    %37 = vector.broadcast %18 : vector<1x128xf32> to vector<26x128xf32>
    %38 = arith.addf %36, %37 : vector<26x128xf32>
    %cst_22 = arith.constant 0.000000e+00 : f32
    %39 = vector.broadcast %cst_22 : f32 to vector<26x128xf32>
    %40 = arith.maximumf %38, %39 : vector<26x128xf32>
    %c24_i32 = arith.constant 24 : i32
    %41 = arith.muli %arg1, %c24_i32 : i32
    %c1_i32_23 = arith.constant 1 : i32
    %42 = arith.subi %41, %c1_i32_23 : i32
    %43 = tpu.iota {dimensions = array<i32: 0>} : vector<26x1xi32>
    %44 = vector.broadcast %42 : i32 to vector<26x1xi32>
    %45 = arith.addi %44, %43 : vector<26x1xi32>
    %c0_i32_24 = arith.constant 0 : i32
    %46 = vector.broadcast %c0_i32_24 : i32 to vector<26x1xi32>
    %47 = arith.cmpi sge, %45, %46 : vector<26x1xi32>
    %c20_i32 = arith.constant 20 : i32
    %48 = vector.broadcast %c20_i32 : i32 to vector<26x1xi32>
    %49 = arith.cmpi slt, %45, %48 : vector<26x1xi32>
    %50 = arith.andi %47, %49 : vector<26x1xi1>
    %cst_25 = arith.constant 0.000000e+00 : f32
    %51 = vector.shape_cast %50 : vector<26x1xi1> to vector<26x1xi1>
    %52 = vector.broadcast %51 : vector<26x1xi1> to vector<26x128xi1>
    %53 = vector.broadcast %cst_25 : f32 to vector<26x128xf32>
    %54 = arith.select %52, %40, %53 : vector<26x128xi1>, vector<26x128xf32>
    %55 = arith.truncf %54 : vector<26x128xf32> to vector<26x128xbf16>
    %56 = vector.extract_strided_slice %55 {offsets = [0, 0], sizes = [24, 128], strides = [1, 1]} : vector<26x128xbf16> to vector<24x128xbf16>
    %c0_26 = arith.constant 0 : index
    %c0_27 = arith.constant 0 : index
    %57 = vector.load %arg5[%c0_26, %c0_27] : memref<384x128xbf16, #tpu.memory_space<vmem>>, vector<128x128xbf16>
    %cst_28 = arith.constant dense<0.000000e+00> : vector<24x128xf32>
    %58 = tpu.matmul %56, %57, %cst_28 {dimension_numbers = #tpu.dot_dimension_numbers<[1], [0], [0], [1], [0, 0, 1, 1], [], []>} : vector<24x128xbf16>, vector<128x128xbf16>, vector<24x128xf32> -> vector<24x128xf32>
    %59 = vector.extract_strided_slice %55 {offsets = [1, 0], sizes = [24, 128], strides = [1, 1]} : vector<26x128xbf16> to vector<24x128xbf16>
    %c128_29 = arith.constant 128 : index
    %c0_30 = arith.constant 0 : index
    %60 = vector.load %arg5[%c128_29, %c0_30] : memref<384x128xbf16, #tpu.memory_space<vmem>>, vector<128x128xbf16>
    %cst_31 = arith.constant dense<0.000000e+00> : vector<24x128xf32>
    %61 = tpu.matmul %59, %60, %cst_31 {dimension_numbers = #tpu.dot_dimension_numbers<[1], [0], [0], [1], [0, 0, 1, 1], [], []>} : vector<24x128xbf16>, vector<128x128xbf16>, vector<24x128xf32> -> vector<24x128xf32>
    %62 = arith.addf %58, %61 : vector<24x128xf32>
    %63 = vector.extract_strided_slice %55 {offsets = [2, 0], sizes = [24, 128], strides = [1, 1]} : vector<26x128xbf16> to vector<24x128xbf16>
    %c256_32 = arith.constant 256 : index
    %c0_33 = arith.constant 0 : index
    %64 = vector.load %arg5[%c256_32, %c0_33] : memref<384x128xbf16, #tpu.memory_space<vmem>>, vector<128x128xbf16>
    %cst_34 = arith.constant dense<0.000000e+00> : vector<24x128xf32>
    %65 = tpu.matmul %63, %64, %cst_34 {dimension_numbers = #tpu.dot_dimension_numbers<[1], [0], [0], [1], [0, 0, 1, 1], [], []>} : vector<24x128xbf16>, vector<128x128xbf16>, vector<24x128xf32> -> vector<24x128xf32>
    %66 = arith.addf %62, %65 : vector<24x128xf32>
    %67 = vector.broadcast %19 : vector<1x128xf32> to vector<24x128xf32>
    %68 = arith.mulf %66, %67 : vector<24x128xf32>
    %69 = vector.broadcast %20 : vector<1x128xf32> to vector<24x128xf32>
    %70 = arith.addf %68, %69 : vector<24x128xf32>
    %71 = vector.extract_strided_slice %16 {offsets = [4, 0], sizes = [24, 128], strides = [1, 1]} : vector<32x128xf32> to vector<24x128xf32>
    %72 = arith.addf %70, %71 : vector<24x128xf32>
    %cst_35 = arith.constant 0.000000e+00 : f32
    %73 = vector.broadcast %cst_35 : f32 to vector<24x128xf32>
    %74 = arith.maximumf %72, %73 : vector<24x128xf32>
    %c0_36 = arith.constant 0 : index
    %c0_37 = arith.constant 0 : index
    %c0_38 = arith.constant 0 : index
    %75 = vector.load %arg7[%c0_36, %c0_37, %c0_38] : memref<1x24x128xf32, #tpu.memory_space<vmem>>, vector<1x24x128xf32>
    %76 = vector.shape_cast %75 : vector<1x24x128xf32> to vector<24x128xf32>
    %77 = vector.shape_cast %74 : vector<24x128xf32> to vector<1x24x128xf32>
    tpu.vector_store %arg7[%c0_36, %c0_37, %c0_38], %77 {strides = array<i32>} : memref<1x24x128xf32, #tpu.memory_space<vmem>>, vector<1x24x128xf32>,
    return
  }
  func.func @transform_1(%arg0: i32, %arg1: i32) -> (i32, i32) {
    %c0_i32 = arith.constant 0 : i32
    %c0_i32_0 = arith.constant 0 : i32
    %c0_i32_1 = arith.constant 0 : i32
    return %c0_i32, %c0_i32_0 : i32, i32
  }
  func.func @transform_2(%arg0: i32, %arg1: i32) -> (i32, i32) {
    %c0_i32 = arith.constant 0 : i32
    %c0_i32_0 = arith.constant 0 : i32
    %c0_i32_1 = arith.constant 0 : i32
    return %c0_i32, %c0_i32_0 : i32, i32
  }
  func.func @transform_3(%arg0: i32, %arg1: i32) -> (i32, i32) {
    %c0_i32 = arith.constant 0 : i32
    %c0_i32_0 = arith.constant 0 : i32
    %c0_i32_1 = arith.constant 0 : i32
    return %c0_i32, %c0_i32_0 : i32, i32
  }
  func.func @transform_4(%arg0: i32, %arg1: i32) -> (i32, i32) {
    %c0_i32 = arith.constant 0 : i32
    %c0_i32_0 = arith.constant 0 : i32
    %c0_i32_1 = arith.constant 0 : i32
    return %c0_i32, %c0_i32_0 : i32, i32
  }
  func.func @transform_5(%arg0: i32, %arg1: i32) -> (i32, i32, i32) {
    %c0_i32 = arith.constant 0 : i32
    %c0_i32_0 = arith.constant 0 : i32
    return %arg0, %arg1, %c0_i32 : i32, i32, i32
  }
}

</mosaic_0001>

<bundles_post_ra>
// kernel: tpu_custom_call.1
= control target key start
LH: loop header
LB: loop body
LE: loop exit
PB: predicated region body
PF: predicated region fallthrough
CT: control target
= control target key end

     0   :  { %10 = vsyncpa [#allocation5], 0  ;;  %s2132_s0 = inlined_call_operand.hbm [shape: f32[2,32,128], index: 0, kind: input, shape index: {}]   ;;  %s2133_s1 = inlined_call_operand.hbm [shape: bf16[384,128], index: 1, kind: input, shape index: {}]   ;;  %s2134_s2 = inlined_call_operand.vmem [shape: f32[2,128], index: 2, kind: input, shape index: {}]   ;;  %s2135_s3 = inlined_call_operand.hbm [shape: bf16[384,128], index: 3, kind: input, shape index: {}]   ;;  %s2136_s4 = inlined_call_operand.vmem [shape: f32[2,128], index: 4, kind: input, shape index: {}]   ;;  %s2137_s5 = inlined_call_operand.hbm [shape: f32[2,24,128], index: 5, kind: output, shape index: {}]  }
   0x1   :  { %11 = vsyncpa [#allocation8], 0 }
   0x2   :  { %12 = vsyncpa [#allocation6], 0 }
   0x3   :  { %14 = vsyncpa [#allocation6 + $0x1], 0  ;;  %s1867_s18 = smov 0   ;;  %s1869_s19 = smov 0  }
   0x4   :  { %s1871_s20 = smov 0   ;;  %s1873_s21 = smov 0  }
   0x5   :  { %s1875_s22 = smov 0   ;;  %s1877_s23 = smov 0  }
   0x6 LB: > { %s1251_s24 = sadd.s32 4294967295, %s1825_s23   ;;  %s1252_s25 = sadd.s32 4294967294, %s1825_s23   ;;  %s1825_s23 = sphi %s1877_s23, %s20_s23   ;;  %s1821_s22 = sphi %s1875_s22, %s2158_s22   ;;  %s1817_s21 = sphi %s1873_s21, %s2157_s21   ;;  %s1813_s20 = sphi %s1871_s20, %s2156_s20   ;;  %s1809_s19 = sphi %s1869_s19, %s2155_s19   ;;  %s1805_s18 = sphi %s1867_s18, %s2154_s18  }
   0x7   : > { %s32_s26 = sadd.s32 1, %s1821_s22  ;;  %s125_s27 = sadd.s32 1, %s1813_s20 }
   0x8   : > { %p34_p0 = scmp.ge.s32.totalorder %s32_s26, 2  ;;  %p135_p1 = scmp.ne.s32.totalorder %s1813_s20, %s1809_s19 }
   0x9   : > { %p136_p2 = scmp.eq.s32.totalorder %s1251_s24, 1  ;;  %p141_p3 = scmp.ne.s32.totalorder %s1809_s19, %s1805_s18 }
   0xa   : > { %s2160_s26 = smov (%p34_p0, %s32_s26), 0  ;;  %p142_p5 = scmp.eq.s32.totalorder %s1252_s25, 1 }
   0xb   : > { %2143 = sst [smem:[#allocation20_spill]] %s2160_s26  ;;  %p1907_p4 = por %p136_p2, %p135_p1 }
   0xc   : > { %s120_s29 = ssub.s32 %s1821_s22, %s2160_s26  ;;  %p1253_p6 = scmp.ge.s32.totalorder %s1825_s23, 1 }
   0xd   : > { %s2144_s28 = scalar_select %p1907_p4, 1, 0 }
   0xe   : > { %p123_p7 = scmp.eq.s32.totalorder %s120_s29, 0  ;;  %p1914_p8 = por %p142_p5, %p141_p3 }
   0xf   : > { %p149_p9 = scmp.lt.s32.totalorder %s1825_s23, 3  ;;  %p1926_p11 = scmp.eq.s32.totalorder %s1251_s24, 0 }
  0x10   : > { %s2145_s30 = scalar_select %p1914_p8, 1, 0 }
  0x11   : > { %s1920_s6 = scalar_select %p123_p7, %s1813_s20, %s125_s27  }
  0x12   : > { %p1922_p10 = pnand %p1253_p6, %p149_p9  ;;  %s1827_s9 = smov [#allocation4]  }
  0x13   : > { %s2147_s8 = scalar_select %p1926_p11, 1, 0 }
  0x14   : > { %s2146_s7 = scalar_select %p1922_p10, 1, 0 }
  0x15   : > { %p1536_p12 = pneg %p1922_p10  ;;  %s161_s10 = sshll.u32 %s1827_s9, 4  ;;  %s162_s10 = int_to_ptr.vmem [resolvable:$true] %s161_s10 }
  0x16   : > { %s1828_s12 = smov [#allocation7]   ;;  %s1657_s16 = scalar_lea.hbm %s2133_s1, 3072 }
  0x17   : > { %p1934_p13 = pnand %p1926_p11, %p1536_p12  ;;  %s177_s13 = sshll.u32 %s1828_s12, 4  ;;  %s1938_s13 = int_to_ptr.vmem [resolvable:$true] %s177_s13 }
  0x18   : > { %p1658_p0 = scmp.ne.s32.totalorder %s2133_s1, %s1657_s16  ;;  %p1664_p5 = scmp.lt.u32.totalorder %s1657_s16, %s2133_s1 }
  0x19   : > { %p1659_p1 = pneg %p1934_p13 }
  0x1b   : > { %p1660_p2 = pnand %p1659_p1, %p1658_p0 }
  0x1d   : > { %p1661_p3 = pneg %p1660_p2 }
  0x1f   : > { %p1666_p6 = pnand %p1664_p5, %p1661_p3 }
  0x21   : > { %1669 = shalt.err (!%p1666_p6)
}
  0x22   : > { %s1670_s29 = scalar_lea.vmem %s162_s10, 3072  ;;  %p1678_p8 = scmp.lt.s32.totalorder %s162_s10, %s162_s10 }
  0x23   : > { %p1671_p7 = scmp.ne.s32.totalorder %s162_s10, %s1670_s29  ;;  %p1679_p4 = scmp.lt.s32.totalorder %s1670_s29, %s1670_s29 }
  0x25   : > { %p1673_p9 = pnand %p1671_p7, %p1659_p1  ;;  %p1680_p11 = por %p1679_p4, %p1678_p8 }
  0x27   : > { %p1674_p12 = pneg %p1673_p9 }
  0x29   : > { %p1681_p10 = pnand %p1680_p11, %p1674_p12 }
  0x2b   : > { %1684 = shalt.err (!%p1681_p10)
}
  0x2c   : > { %s1829_s9 = smov 64   ;;  %s1830_s12 = smov 4  }
  0x2d   : > { %1539 = dma.hbm_to_vmem [thread:$0]  (!%p1934_p13), %s2133_s1, 3072, %s162_s10, [#allocation5], %s1829_s9, %s1829_s9, %s1830_s12  }
  0x2e   : > { %s1685_s24 = scalar_lea.hbm %s2135_s3, 3072 }
  0x2f   : > { %p1686_p0 = scmp.ne.s32.totalorder %s2135_s3, %s1685_s24  ;;  %p1692_p10 = scmp.lt.u32.totalorder %s1685_s24, %s2135_s3 }
  0x31   : > { %p1688_p4 = pnand %p1686_p0, %p1659_p1 }
  0x33   : > { %p1689_p8 = pneg %p1688_p4 }
  0x35   : > { %p1694_p11 = pnand %p1692_p10, %p1689_p8 }
  0x37   : > { %1697 = shalt.err (!%p1694_p11)
}
  0x38   : > { %s1698_s10 = scalar_lea.vmem %s1938_s13, 3072  ;;  %p1706_p6 = scmp.lt.s32.totalorder %s1938_s13, %s1938_s13 }
  0x39   : > { %p1699_p2 = scmp.ne.s32.totalorder %s1938_s13, %s1698_s10  ;;  %p1707_p7 = scmp.lt.s32.totalorder %s1698_s10, %s1698_s10 }
  0x3b   : > { %p1701_p3 = pnand %p1699_p2, %p1659_p1  ;;  %p1708_p9 = por %p1707_p7, %p1706_p6 }
  0x3d   : > { %p1702_p5 = pneg %p1701_p3 }
  0x3f   : > { %p1709_p12 = pnand %p1708_p9, %p1702_p5 }
  0x41   : > { %1712 = shalt.err (!%p1709_p12)
}
  0x42   : > { %1542 = dma.hbm_to_vmem [thread:$0]  (!%p1934_p13), %s2135_s3, 3072, %s1938_s13, [#allocation8], %s1829_s9, %s1829_s9, %s1830_s12  }
  0x43   : > { %p2149_p0 = scmp.ne.s32.totalorder %s2146_s7, 0 }
  0x44   : > { %p2150_p4 = scmp.ne.s32.totalorder (!%p2149_p0), %s2147_s8, 0 }
  0x45   : > { %196 = sbr.rel (%p2149_p0) target bundleno = 735 (0x2df), region = 36 }
  0x4c   : > { %1790 = dma.done.wait (%p2150_p4), [#allocation5], 3072  }
  0x4d   : > { %1792 = vsyncadd (%p2150_p4), [#allocation5], 4294964224 }
  0x4e   : > { %1794 = dma.done.wait (%p2150_p4), [#allocation8], 3072  }
  0x4f   : > { %1796 = vsyncadd (%p2150_p4), [#allocation8], 4294964224  ;;  %s218_s11 = sand.u32 1, %s1809_s19   ;;  %s1326_s13 = sshll.u32 %s1817_s21, 9 }
  0x50   : > { %s1524_s7 = smul.u32 24, %s218_s11  ;;  %s232_s15 = scalar_lea.hbm %s2132_s0, %s1326_s13 }
  0x51   : > { %s1831_s16 = smov [#allocation2]   ;;  %s1713_s24 = scalar_lea.hbm %s232_s15, 512 }
  0x52   : > { %s240_s17 = sshll.u32 %s1831_s16, 4  ;;  %p1714_p13 = scmp.ne.s32.totalorder %s232_s15, %s1713_s24  ;;  %s241_s17 = int_to_ptr.vmem [resolvable:$true] %s240_s17 }
  0x53   : > { %s1715_s8 = scalar_lea.hbm %s2132_s0, 1024  ;;  %p1716_p1 = scmp.lt.u32.totalorder %s232_s15, %s2132_s0 }
  0x54   : > { %p1717_p8 = scmp.lt.u32.totalorder %s1715_s8, %s1713_s24  ;;  %p1719_p11 = scmp.lt.u32.totalorder %s1713_s24, %s232_s15 }
  0x56   : > { %p1718_p10 = por %p1717_p8, %p1716_p1 }
  0x58   : > { %p1720_p2 = por %p1719_p11, %p1718_p10 }
  0x5a   : > { %p1721_p3 = pnand %p1720_p2, %p1714_p13 }
  0x5c   : > { %1724 = shalt.err (!%p1721_p3)  }
  0x5d   : > { %s1725_s26 = scalar_lea.vmem %s241_s17, 512  ;;  %s1729_s14 = scalar_lea.vmem %s241_s17, 1024 }
  0x5e   : > { %p1726_p5 = scmp.ne.s32.totalorder %s241_s17, %s1725_s26  ;;  %p1730_p6 = scmp.lt.s32.totalorder %s241_s17, %s241_s17 }
  0x5f   : > { %p1731_p7 = scmp.lt.s32.totalorder %s1729_s14, %s1725_s26 }
  0x61   : > { %p1732_p9 = por %p1731_p7, %p1730_p6 }
  0x63   : > { %p1733_p12 = pnand %p1732_p9, %p1726_p5 }
  0x65   : > { %1736 = shalt.err (!%p1733_p12)  }
  0x66   : > { %243 = dma.hbm_to_vmem [thread:$0]  %s232_s15, 512, %s241_s17, [#allocation3] }
  0x67   : > { %s2010_s13 = scalar_lea.vmem [#allocation9], %s1524_s7 }
  0x68   : > { %1797 = dma.done.wait [#allocation3], 512 }
  0x69   : > { %1798 = vsyncadd [#allocation3], 4294966784  ;;  %v1609_v0 = vld [vmem:[#allocation4 + $0x40] sm:$0xff]   ;;  %v1610_v1 = vld [vmem:[#allocation4 + $0x48] sm:$0xff]   ;;  %vm317_vm0 = vsmask.f32 6400  ;;  %v684_v56 = vlaneseq }
  0x6a   : > { %1388 = vmatprep.subr.bf16.mxu0 %v1609_v0  ;;  %v1611_v2 = vld [vmem:[#allocation4 + $0x50] sm:$0xff]   ;;  %v1612_v3 = vld [vmem:[#allocation4 + $0x58] sm:$0xff]   ;;  %v2012_v4 = vld [vmem:[#allocation2] sm:$0xff]  ;;  %vm436_vm1 = vcmask 1046528   ;;  %vm555_vm2 = vcmask 1045504   ;;  %vm1833_vm6 = vmmov 1  }
  0x6b   : > { %1389 = vmatpush3.bf16.msra.mxu0 %v1609_v0  ;;  %v2014_v5 = vld [vmem:[#allocation2 + $0x8] sm:$0xff]  ;;  %v2016_v6 = vld [vmem:[#allocation2 + $0x10] sm:$0xff]  ;;  %v2018_v7 = vld [vmem:[#allocation2 + $0x18] sm:$0xff]  ;;  %v685_v57 = vshrl.u32 %v684_v56, 7  ;;  %vm752_vm5 = vsmask.f32 7424 }
  0x6c   : > { %1390 = vmatprep.subr.bf16.mxu0 %v1610_v1  ;;  %v2022_v8 = vpack.c.bf16 %v2014_v5, %v2012_v4  ;;  %v2026_v9 = vpack.c.bf16 %v2018_v7, %v2016_v6  ;;  %v1613_v10 = vld [vmem:[#allocation4 + $0x60] sm:$0xff]   ;;  %v1614_v20 = vld [vmem:[#allocation4 + $0x68] sm:$0xff]   ;;  %v1615_v23 = vld [vmem:[#allocation4 + $0x70] sm:$0xff]   ;;  %vm1102_vm9 = vcmask 1043456   ;;  %s1525_s27 = smul.u32 384, %s1817_s21  ;;  %s1138_s8 = sshll.u32 %s2010_s13, 4  ;;  %s2080_s8 = int_to_ptr.vmem [resolvable:$true] %s1138_s8 }
  0x6d   : > { %v1616_v24 = vld [vmem:[#allocation4 + $0x78] sm:$0xff]   ;;  %v1617_v25 = vld [vmem:[#allocation4] sm:$0xff]   ;;  %v1634_v27 = vld [vmem:[#allocation7 + $0x48] sm:$0xff]   ;;  %v687_v58 = vadd.s32 16, %v685_v57  ;;  %s2086_s21 = scalar_lea.sflag [#allocation6], %s218_s11  ;;  %s1737_s14 = scalar_lea.vmem %s2080_s8, 384 }
  0x6e   : > { %v319_v11 = vshrl.u32 %v2022_v8, 16  ;;  %v322_v12 = vshll.u32 %v2022_v8, 16  ;;  %v327_v13 = vshrl.u32 %v2026_v9, 16  ;;  %v330_v14 = vshll.u32 %v2026_v9, 16  ;;  %v1633_v26 = vld [vmem:[#allocation7 + $0x40] sm:$0xff]   ;;  %v1618_v30 = vld [vmem:[#allocation4 + $0x8] sm:$0xff]   ;;  %s2078_s26 = scalar_lea.hbm %s2137_s5, %s1525_s27  ;;  %p1738_p0 = scmp.ne.s32.totalorder %s2080_s8, %s1737_s14 }
  0x6f   : > { %1391 = vmatpush3.bf16.msra.mxu0 %v1610_v1  ;;  %v437_v28 = vrot.slane %v2022_v8, 1  ;;  %v438_v29 = vrot.slane %v2026_v9, 1  ;;  %1448 = vmatprep.subr.bf16.mxu1 %v1633_v26  ;;  %v1635_v31 = vld [vmem:[#allocation7 + $0x50] sm:$0xff]   ;;  %v1636_v33 = vld [vmem:[#allocation7 + $0x58] sm:$0xff]   ;;  %v1621_v36 = vld [vmem:[#allocation4 + $0x20] sm:$0xff]   ;;  %v556_v41 = vrot.slane %v2022_v8, 2 }
  0x70   : > { %1392 = vmatprep.subr.bf16.mxu0 %v1611_v2  ;;  %v321_v15 = vrot.slane %v319_v11, 1  ;;  %v324_v16 = vrot.slane %v322_v12, 2  ;;  %v329_v17 = vrot.slane %v327_v13, 1  ;;  %v332_v18 = vrot.slane %v330_v14, 2  ;;  %1449 = vmatpush3.bf16.msra.mxu1 %v1633_v26  ;;  %v1619_v34 = vld [vmem:[#allocation4 + $0x10] sm:$0xff]   ;;  %v1620_v35 = vld [vmem:[#allocation4 + $0x18] sm:$0xff]  }
  0x71   : > { %1450 = vmatprep.subr.bf16.mxu1 %v1634_v27  ;;  %v439_v32 = vsel %vm436_vm1, %v437_v28, %v438_v29  ;;  %v1622_v37 = vld [vmem:[#allocation4 + $0x28] sm:$0xff]   ;;  %v1623_v38 = vld [vmem:[#allocation4 + $0x30] sm:$0xff]   ;;  %v1624_v39 = vld [vmem:[#allocation4 + $0x38] sm:$0xff]   ;;  %v557_v42 = vrot.slane %v2026_v9, 2  ;;  %v692_v62 = vadd.s32 4294967295, %v687_v58  ;;  %v690_v1 = vadd.s32 4294967295, %v685_v57 }
  0x72   : > { %v325_v19 = vor.u32 %v324_v16, %v321_v15  ;;  %v333_v21 = vor.u32 %v332_v18, %v329_v17  ;;  %v1625_v40 = vld [vmem:[#allocation4 + $0x80] sm:$0xff]   ;;  %v1626_v43 = vld [vmem:[#allocation4 + $0x88] sm:$0xff]   ;;  %v1627_v45 = vld [vmem:[#allocation4 + $0x90] sm:$0xff]   ;;  %v1832_v16 = vmov 0.0   ;;  %p2151_p4 = scmp.ne.s32.totalorder %s2144_s28, 0  ;;  %s1834_s7 = smov [#allocation9]  }
  0x73   : > { %1393 = vmatpush3.bf16.msra.mxu0 %v1611_v2  ;;  %v558_v44 = vsel %vm555_vm2, %v556_v41, %v557_v42  ;;  %v1628_v46 = vld [vmem:[#allocation4 + $0x98] sm:$0xff]   ;;  %v1629_v47 = vld [vmem:[#allocation4 + $0xa0] sm:$0xff]   ;;  %v1630_v48 = vld [vmem:[#allocation4 + $0xa8] sm:$0xff]   ;;  %vm700_vm3 = vcmp.lt.s32.totalorder %v692_v62, 20  ;;  %vm694_vm4 = vcmp.ge.s32.totalorder %v690_v1, 0  ;;  %s1741_s9 = sshll.u32 %s1834_s7, 4  ;;  %s1742_s9 = int_to_ptr.vmem [resolvable:$false] %s1741_s9 }
  0x74   : > { %1394 = vmatprep.subr.bf16.mxu0 %v1612_v3  ;;  %v334_v22 = vsel %vm317_vm0, %v325_v19, %v333_v21  ;;  %1451 = vmatpush3.bf16.msra.mxu1 %v1634_v27  ;;  %v1631_v49 = vld [vmem:[#allocation4 + $0xb0] sm:$0xff]   ;;  %v1632_v50 = vld [vmem:[#allocation4 + $0xb8] sm:$0xff]   ;;  %v1637_v51 = vld [vmem:[#allocation7 + $0x60] sm:$0xff]   ;;  %p1739_p13 = pnand %p1738_p0, %p2151_p4  ;;  %s1743_s12 = scalar_lea.vmem %s1742_s9, 768 }
  0x75   : > { %1404 = vmatprep.mubr.bf16.mxu0 %v334_v22  ;;  %1452 = vmatprep.subr.bf16.mxu1 %v1635_v31  ;;  %v1638_v52 = vld [vmem:[#allocation7 + $0x68] sm:$0xff]   ;;  %v1639_v53 = vld [vmem:[#allocation7 + $0x70] sm:$0xff]   ;;  %v1640_v54 = vld [vmem:[#allocation7 + $0x78] sm:$0xff]   ;;  %p1744_p8 = scmp.lt.s32.totalorder %s2080_s8, %s1742_s9  ;;  %p1745_p10 = scmp.lt.s32.totalorder %s1743_s12, %s1737_s14 }
  0x76   : > { %v1641_v55 = vld [vmem:[#allocation7] sm:$0xff]   ;;  %vm1305_vm7 = vmpackc.low %vm1833_vm6, %vm694_vm4  ;;  %p1740_p1 = pneg %p1739_p13 }
  0x77   : > { %1395 = vmatpush3.bf16.msra.mxu0 %v1612_v3  ;;  %v1287_v59 = vld [vmem:[%s2134_s2] ss:$0 sm:$0xff]  ;;  %v1288_v60 = vld [vmem:[%s2134_s2 + $0x1] ss:$0 sm:$0xff]  ;;  %vm1308_vm8 = vmpackc.low %vm1833_vm6, %vm700_vm3  ;;  %p1746_p11 = por %p1745_p10, %p1744_p8 }
  0x78   : > { %1396 = vmatprep.subr.bf16.mxu0 %v1613_v10  ;;  %1453 = vmatpush3.bf16.msra.mxu1 %v1635_v31  ;;  %v1649_v41 = vld [vmem:[#allocation7 + $0x80] sm:$0xff]  }
  0x79   : > { %1454 = vmatprep.subr.bf16.mxu1 %v1636_v33  ;;  %p1747_p2 = pnand %p1746_p11, %p1740_p1 }
  0x7b   : > { %1397 = vmatpush3.bf16.msra.mxu0 %v1613_v10 }
  0x7c   : > { %1398 = vmatprep.subr.bf16.mxu0 %v1614_v20  ;;  %1455 = vmatpush3.bf16.msra.mxu1 %v1636_v33 }
  0x7d   : > { %1456 = vmatprep.subr.bf16.mxu1 %v1637_v51 }
  0x7f   : > { %1399 = vmatpush3.bf16.msra.mxu0 %v1614_v20 }
  0x80   : > { %1400 = vmatprep.subr.bf16.mxu0 %v1615_v23  ;;  %1457 = vmatpush3.bf16.msra.mxu1 %v1637_v51  ;;  %v1106_v51 = vrot.slane %v2016_v6, 4 }
  0x81   : > { %1458 = vmatprep.subr.bf16.mxu1 %v1638_v52 }
  0x83   : > { %1401 = vmatpush3.bf16.msra.mxu0 %v1615_v23 }
  0x84   : > { %1402 = vmatprep.subr.bf16.mxu0 %v1616_v24  ;;  %1459 = vmatpush3.bf16.msra.mxu1 %v1638_v52  ;;  %v1108_v52 = vrot.slane %v2018_v7, 4 }
  0x85   : > { %1460 = vmatprep.subr.bf16.mxu1 %v1639_v53 }
  0x87   : > { %1403 = vmatpush3.bf16.msra.mxu0 %v1616_v24 }
  0x88   : > { %1408 = vmatprep.subr.bf16.mxu0 %v1617_v25  ;;  %1461 = vmatpush3.bf16.msra.mxu1 %v1639_v53  ;;  %v1103_v53 = vrot.slane %v2012_v4, 4 }
  0x89   : > { %1462 = vmatprep.subr.bf16.mxu1 %v1640_v54 }
  0x8a   : > { %1405 = vmatmul.mubr.bf16.vlgmr.msra.gmra.mrb[0].mxu0 %v333_v21 }
  0x8b   : > { %1409 = vmatpush3.bf16.msra.mxu0 %v1617_v25  ;;  %1424 = vmatprep.mubr.bf16.mxu0 %v439_v32 }
  0x8c   : > { %1410 = vmatprep.subr.bf16.mxu0 %v1618_v30  ;;  %1463 = vmatpush3.bf16.msra.mxu1 %v1640_v54  ;;  %v1104_v54 = vrot.slane %v2014_v5, 4 }
  0x8d   : > { %1468 = vmatprep.subr.bf16.mxu1 %v1641_v55 }
  0x8f   : > { %1411 = vmatpush3.bf16.msra.mxu0 %v1618_v30 }
  0x90   : > { %1412 = vmatprep.subr.bf16.mxu0 %v1619_v34 }
  0x93   : > { %1413 = vmatpush3.bf16.msra.mxu0 %v1619_v34  ;;  %v1642_v34 = vld [vmem:[#allocation7 + $0x8] sm:$0xff]  }
  0x94   : > { %1414 = vmatprep.subr.bf16.mxu0 %v1620_v35 }
  0x97   : > { %1415 = vmatpush3.bf16.msra.mxu0 %v1620_v35  ;;  %v1643_v35 = vld [vmem:[#allocation7 + $0x10] sm:$0xff]  }
  0x98   : > { %1416 = vmatprep.subr.bf16.mxu0 %v1621_v36 }
  0x9b   : > { %1417 = vmatpush3.bf16.msra.mxu0 %v1621_v36  ;;  %v1644_v36 = vld [vmem:[#allocation7 + $0x18] sm:$0xff]  }
  0x9c   : > { %1418 = vmatprep.subr.bf16.mxu0 %v1622_v37 }
  0x9f   : > { %1419 = vmatpush3.bf16.msra.mxu0 %v1622_v37  ;;  %v1645_v37 = vld [vmem:[#allocation7 + $0x20] sm:$0xff]  }
  0xa0   : > { %1420 = vmatprep.subr.bf16.mxu0 %v1623_v38 }
  0xa3   : > { %1421 = vmatpush3.bf16.msra.mxu0 %v1623_v38  ;;  %v1646_v38 = vld [vmem:[#allocation7 + $0x28] sm:$0xff]  }
  0xa4   : > { %1422 = vmatprep.subr.bf16.mxu0 %v1624_v39 }
  0xa7   : > { %1423 = vmatpush3.bf16.msra.mxu0 %v1624_v39  ;;  %v1647_v39 = vld [vmem:[#allocation7 + $0x30] sm:$0xff]  }
  0xa8   : > { %1428 = vmatprep.subr.bf16.mxu0 %v1625_v40 }
  0xaa   : > { %1425 = vmatmul.mubr.bf16.vlgmr.msra.gmra.mrb[0].mxu0 %v438_v29 }
  0xab   : > { %1429 = vmatpush3.bf16.msra.mxu0 %v1625_v40  ;;  %1444 = vmatprep.mubr.bf16.mxu0 %v558_v44  ;;  %v1648_v40 = vld [vmem:[#allocation7 + $0x38] sm:$0xff]   ;;  %v1651_v44 = vld [vmem:[#allocation7 + $0x90] sm:$0xff]  }
  0xac   : > { %1430 = vmatprep.subr.bf16.mxu0 %v1626_v43 }
  0xaf   : > { %1431 = vmatpush3.bf16.msra.mxu0 %v1626_v43  ;;  %v1650_v43 = vld [vmem:[#allocation7 + $0x88] sm:$0xff]  }
  0xb0   : > { %1432 = vmatprep.subr.bf16.mxu0 %v1627_v45 }
  0xb3   : > { %1433 = vmatpush3.bf16.msra.mxu0 %v1627_v45  ;;  %v1652_v45 = vld [vmem:[#allocation7 + $0x98] sm:$0xff]  }
  0xb4   : > { %1434 = vmatprep.subr.bf16.mxu0 %v1628_v46 }
  0xb7   : > { %1435 = vmatpush3.bf16.msra.mxu0 %v1628_v46  ;;  %v1653_v46 = vld [vmem:[#allocation7 + $0xa0] sm:$0xff]  }
  0xb8   : > { %1436 = vmatprep.subr.bf16.mxu0 %v1629_v47 }
  0xbb   : > { %1437 = vmatpush3.bf16.msra.mxu0 %v1629_v47  ;;  %v1654_v47 = vld [vmem:[#allocation7 + $0xa8] sm:$0xff]  }
  0xbc   : > { %1438 = vmatprep.subr.bf16.mxu0 %v1630_v48 }
  0xbf   : > { %1439 = vmatpush3.bf16.msra.mxu0 %v1630_v48  ;;  %v1655_v48 = vld [vmem:[#allocation7 + $0xb0] sm:$0xff]  }
  0xc0   : > { %1440 = vmatprep.subr.bf16.mxu0 %v1631_v49 }
  0xc3   : > { %1441 = vmatpush3.bf16.msra.mxu0 %v1631_v49  ;;  %v1656_v49 = vld [vmem:[#allocation7 + $0xb8] sm:$0xff]  }
  0xc4   : > { %1442 = vmatprep.subr.bf16.mxu0 %v1632_v50 }
  0xc7   : > { %1443 = vmatpush3.bf16.msra.mxu0 %v1632_v50  ;;  %v1319_v50 = vld [vmem:[%s2136_s4] ss:$0 sm:$0xff] }
  0xca   : > { %1445 = vmatmul.mubr.bf16.vlgmr.msra.gmra.mrb[0].mxu0 %v557_v42 }
 0x19d   : > { %v1446_v61 = vpop.f32.mrb[0].mxu0 }
 0x19e   : > { %v668_v63 = vmul.f32 %v1446_v61, %v1287_v59  ;;  %v643_v0 = vpop.f32.mrb[1].mxu0  ;;  %v1105_v61 = vsel %vm1102_vm9, %v1103_v53, %v1104_v54 }
 0x19f   : > { %v666_v2 = vmul.f32 %v1287_v59, %v643_v0  ;;  %v1447_v3 = vpop.f32.mrb[2].mxu0  ;;  %v1107_v0 = vsel %vm1102_vm9, %v1104_v54, %v1106_v51 }
 0x1a0   : > { %v676_v8 = vadd.f32 %v1288_v60, %v668_v63  ;;  %v646_v9 = vpop.f32.mrb[3].mxu0 }
 0x1a1   : > { %v674_v10 = vadd.f32 %v1288_v60, %v666_v2  ;;  %v667_v11 = vmul.f32 %v1287_v59, %v646_v9  ;;  %v1109_v59 = vsel %vm1102_vm9, %v1106_v51, %v1108_v52 }
 0x1a2   : > { %v680_v12 = vmax.f32 %v676_v8, 0.0 }
 0x1a3   : > { %v678_v13 = vmax.f32 %v674_v10, 0.0  ;;  %v675_v14 = vadd.f32 %v1288_v60, %v667_v11 }
 0x1a4   : > { %v716_v15 = vsel %vm700_vm3, %v680_v12, 0.0  ;;  %v1309_v42 = vpack.c.bf16 %v1832_v16, %v680_v12 }
 0x1a5   : > { %v2044_v17 = vpack.c.bf16 %v1832_v16, %v716_v15  ;;  %v714_v18 = vsel %vm694_vm4, %v678_v13, 0.0  ;;  %v679_v19 = vmax.f32 %v675_v14, 0.0 }
 0x1a7   : > { %v718_v20 = vpack.c.bf16 %v679_v19, %v714_v18  ;;  %v1306_v21 = vpack.c.bf16 %v679_v19, %v678_v13  ;;  %v761_v22 = vshll.u32 %v2044_v17, 16  ;;  %v981_v25 = vrot.slane %v2044_v17, 1 }
 0x1a8   : > { %v765_v31 = vshrl.u32 %v2044_v17, 16 }
 0x1a9   : > { %v756_v23 = vshll.u32 %v718_v20, 16  ;;  %v980_v24 = vrot.slane %v718_v20, 1  ;;  %v754_v26 = vshrl.u32 %v718_v20, 16  ;;  %v763_v28 = vrot.slane %v761_v22, 1 }
 0x1ab   : > { %v758_v27 = vrot.slane %v756_v23, 1  ;;  %v982_v29 = vsel %vm436_vm1, %v980_v24, %v981_v25  ;;  %v767_v33 = vor.u32 %v765_v31, %v763_v28 }
 0x1ad   : > { %v759_v30 = vor.u32 %v758_v27, %v754_v26 }
 0x1af   : > { %v764_v32 = vsel %vm752_vm5, %v759_v30, %v763_v28 }
 0x1b0   : > { %1464 = vmatprep.mubr.bf16.mxu1 %v764_v32 }
 0x1b1   : > { %1465 = vmatmul.mubr.bf16.vlgmr.msra.gmra.mrb[0].mxu1 %v767_v33 }
 0x1b2   : > { %1469 = vmatpush3.bf16.msra.mxu1 %v1641_v55  ;;  %1484 = vmatprep.mubr.msk.bf16.mxu1 %vm1305_vm7, %v1306_v21  ;;  %v1320_v55 = vld [vmem:[%s2136_s4 + $0x1] ss:$0 sm:$0xff] }
 0x1b3   : > { %1470 = vmatprep.subr.bf16.mxu1 %v1642_v34 }
 0x1b6   : > { %1471 = vmatpush3.bf16.msra.mxu1 %v1642_v34 }
 0x1b7   : > { %1472 = vmatprep.subr.bf16.mxu1 %v1643_v35 }
 0x1ba   : > { %1473 = vmatpush3.bf16.msra.mxu1 %v1643_v35 }
 0x1bb   : > { %1474 = vmatprep.subr.bf16.mxu1 %v1644_v36 }
 0x1be   : > { %1475 = vmatpush3.bf16.msra.mxu1 %v1644_v36 }
 0x1bf   : > { %1476 = vmatprep.subr.bf16.mxu1 %v1645_v37 }
 0x1c2   : > { %1477 = vmatpush3.bf16.msra.mxu1 %v1645_v37 }
 0x1c3   : > { %1478 = vmatprep.subr.bf16.mxu1 %v1646_v38 }
 0x1c6   : > { %1479 = vmatpush3.bf16.msra.mxu1 %v1646_v38 }
 0x1c7   : > { %1480 = vmatprep.subr.bf16.mxu1 %v1647_v39 }
 0x1ca   : > { %1481 = vmatpush3.bf16.msra.mxu1 %v1647_v39 }
 0x1cb   : > { %1482 = vmatprep.subr.bf16.mxu1 %v1648_v40 }
 0x1ce   : > { %1483 = vmatpush3.bf16.msra.mxu1 %v1648_v40 }
 0x1cf   : > { %1488 = vmatprep.subr.bf16.mxu1 %v1649_v41 }
 0x1d1   : > { %1485 = vmatmul.mubr.msk.bf16.vlgmr.msra.gmra.mrb[0].mxu1 %vm1308_vm8, %v1309_v42 }
 0x1d2   : > { %1489 = vmatpush3.bf16.msra.mxu1 %v1649_v41  ;;  %1504 = vmatprep.mubr.bf16.mxu1 %v982_v29 }
 0x1d3   : > { %1490 = vmatprep.subr.bf16.mxu1 %v1650_v43 }
 0x1d6   : > { %1491 = vmatpush3.bf16.msra.mxu1 %v1650_v43 }
 0x1d7   : > { %1492 = vmatprep.subr.bf16.mxu1 %v1651_v44 }
 0x1da   : > { %1493 = vmatpush3.bf16.msra.mxu1 %v1651_v44 }
 0x1db   : > { %1494 = vmatprep.subr.bf16.mxu1 %v1652_v45 }
 0x1de   : > { %1495 = vmatpush3.bf16.msra.mxu1 %v1652_v45 }
 0x1df   : > { %1496 = vmatprep.subr.bf16.mxu1 %v1653_v46 }
 0x1e2   : > { %1497 = vmatpush3.bf16.msra.mxu1 %v1653_v46 }
 0x1e3   : > { %1498 = vmatprep.subr.bf16.mxu1 %v1654_v47 }
 0x1e6   : > { %1499 = vmatpush3.bf16.msra.mxu1 %v1654_v47 }
 0x1e7   : > { %1500 = vmatprep.subr.bf16.mxu1 %v1655_v48 }
 0x1ea   : > { %1501 = vmatpush3.bf16.msra.mxu1 %v1655_v48 }
 0x1eb   : > { %1502 = vmatprep.subr.bf16.mxu1 %v1656_v49 }
 0x1ee   : > { %1503 = vmatpush3.bf16.msra.mxu1 %v1656_v49 }
 0x1f1   : > { %1505 = vmatmul.mubr.bf16.vlgmr.msra.gmra.mrb[0].mxu1 %v981_v25 }
 0x2c4   : > { %v1506_v56 = vpop.f32.mrb[0].mxu1 }
 0x2c5   : > { %v1090_v57 = vmul.f32 %v1506_v56, %v1319_v50  ;;  %v1067_v58 = vpop.f32.mrb[1].mxu1 }
 0x2c6   : > { %v1088_v60 = vmul.f32 %v1319_v50, %v1067_v58  ;;  %v1507_v6 = vpop.f32.mrb[2].mxu1 }
 0x2c7   : > { %v1097_v7 = vadd.f32 %v1320_v55, %v1090_v57  ;;  %v1070_v4 = vpop.f32.mrb[3].mxu1 }
 0x2c8   : > { %v1095_v62 = vadd.f32 %v1320_v55, %v1088_v60  ;;  %v1089_v5 = vmul.f32 %v1319_v50, %v1070_v4 }
 0x2c9   : > { %v1115_v63 = vadd.f32 %v1109_v59, %v1097_v7 }
 0x2ca   : > { %v1113_v1 = vadd.f32 %v1105_v61, %v1095_v62  ;;  %v1096_v2 = vadd.f32 %v1320_v55, %v1089_v5 }
 0x2cb   : > { %v1118_v3 = vmax.f32 %v1115_v63, 0.0 }
 0x2cc   : > { %v1116_v8 = vmax.f32 %v1113_v1, 0.0  ;;  %v1114_v9 = vadd.f32 %v1107_v0, %v1096_v2 }
 0x2cd   : > { %1121 = vst [vmem:[%s2010_s13 + $0x10] sm:$0xff] %v1118_v3 }
 0x2ce   : > { %1119 = vst [vmem:[%s2010_s13] sm:$0xff] %v1116_v8  ;;  %v1117_v10 = vmax.f32 %v1114_v9, 0.0 }
 0x2d0   : > { %1120 = vst [vmem:[%s2010_s13 + $0x8] sm:$0xff] %v1117_v10 }
 0x2d1   : > { %1750 = shalt.err (!%p1747_p2)
}
 0x2d2   : > { %s1751_s11 = scalar_lea.hbm %s2078_s26, 384  ;;  %s1755_s16 = scalar_lea.hbm %s2137_s5, 768 }
 0x2d3   : > { %p1752_p3 = scmp.ne.s32.totalorder %s2078_s26, %s1751_s11  ;;  %p1756_p7 = scmp.lt.u32.totalorder %s2078_s26, %s2137_s5 }
 0x2d4   : > { %p1757_p9 = scmp.lt.u32.totalorder %s1755_s16, %s1751_s11  ;;  %p1759_p0 = scmp.lt.u32.totalorder %s1751_s11, %s2078_s26 }
 0x2d5   : > { %p1753_p5 = pnand %p1752_p3, %p2151_p4 }
 0x2d6   : > { %p1758_p12 = por %p1757_p9, %p1756_p7 }
 0x2d7   : > { %p1754_p6 = pneg %p1753_p5 }
 0x2d8   : > { %p1760_p13 = por %p1759_p0, %p1758_p12 }
 0x2da   : > { %p1761_p1 = pnand %p1760_p13, %p1754_p6 }
 0x2dc   : > { %1764 = shalt.err (!%p1761_p1)
}
 0x2dd   : > { %s1835_s25 = smov 128   ;;  %s1836_s27 = smov 8  }
 0x2de   : > { %1534 = dma.vmem_to_hbm [thread:$0]  (%p2151_p4), %s2080_s8, 384, %s2078_s26, %s2086_s21, %s1835_s25, %s1835_s25, %s1836_s27  }
 0x2df PF: > { %p1551_p8 = scmp.ge.s32.totalorder %s1825_s23, 2  ;;  %s1153_s29 = sand.u32 1, %s1805_s18  }
 0x2e0   : > { %p2152_p10 = scmp.ne.s32.totalorder %s2145_s30, 0  ;;  %s1154_s10 = scalar_lea.sflag [#allocation6], %s1153_s29 }
 0x2e2   : > { %p1544_p11 = pnand %p1551_p8, %p2152_p10 }
 0x2e4   : > { %1800 = dma.done.wait (!%p1544_p11), %s1154_s10, 384  }
 0x2e5   : > { %1802 = vsyncadd (!%p1544_p11), %s1154_s10, 4294966912  ;;  %s20_s23 = sadd.s32 1, %s1825_s23   ;;  %s2153_s28 = sld [smem:[#allocation20_spill]] }
 0x2e6   : > { %p17_p2 = scmp.ge.s32.totalorder %s20_s23, 4   ;;  %s2154_s18 = smov %s1809_s19 }
 0x2e7   : > { %s2155_s19 = smov %s1813_s20  ;;  %s2156_s20 = smov %s1920_s6 }
 0x2e8   : > { %s2157_s21 = smov %s1821_s22  ;;  %19 = sbr.rel (!%p17_p2) target bundleno = 6 (0x6), region = 100 }
 0x2eb   : > { %s2158_s22 = smov %s2153_s28 }
 0x2ef   :  { %1159 = vsyncpa [#allocation5], 1 }
 0x2f0   :  { %1161 = vsyncpa [#allocation5 + $0x1], 1 }
 0x2f1   :  { %1162 = vsyncpa [#allocation8], 1 }
 0x2f2   :  { %1163 = vsyncpa [#allocation6], 1 }
 0x2f3   :  { %1165 = vsyncpa [#allocation6 + $0x1], 1 }
 0x2f4   :  { %1166 = vsyncmov [#allocation3] }
 0x2f7   :  { %s1167_s30 = vpop.sfrf %1166 }
 0x2f8   :  { %p1324_p4 = scmp.ne.s32.totalorder %s1167_s30, 0 }
 0x2fa   :  { %1171 = shalt.err (%p1324_p4)  }
 0x2fb   :  { %1173 = vsyncmov [#allocation3 + $0x1] }
 0x2fe   :  { %s1174_s8 = vpop.sfrf %1173 }
 0x2ff   :  { %p1325_p3 = scmp.ne.s32.totalorder %s1174_s8, 0 }
 0x301   :  { %1178 = shalt.err (%p1325_p3)  }

</bundles_post_ra>
